<compile_context>
chip_gen: v7x
topology: tpu7x:2x2x1
jax: 0.10.0
libtpu: 0.0.40
codegen_flags: <defaults>
</compile_context>

<pallas_src>
import functools
import math

import jax
import jax.numpy as jnp
from jax import lax
from jax.experimental import pallas as pl
from jax.experimental.pallas import tpu as pltpu


def _round_up(n, m):
    return ((n + m - 1) // m) * m


def _mlp_kernel(*refs, num_layers, out_valid, out_padded):
    """refs = (x_ref, w0, b0, w1, b1, ..., w_{L-1}, b_{L-1}, out_ref).

    x_ref is a (block_rows, in_dim) tile (K dim unpadded); params are whole
    (lane-padded) arrays kept resident in VMEM (not pipelined).
    """
    x_ref = refs[0]
    out_ref = refs[-1]
    params = refs[1:-1]

    h = x_ref[...]

    # Hidden layers: Linear -> ReLU.  Dropout is identity (p=0 / eval mode).
    # TODO(synk): dropout with p > 0 (training-mode RNG mask) is not implemented.
    for i in range(num_layers - 1):
        w = params[2 * i][...]
        b = params[2 * i + 1][...].astype(jnp.float32)
        acc = jnp.dot(h, w, preferred_element_type=jnp.float32) + b
        acc = jnp.maximum(acc, 0.0)          # elementwise kept in f32 (v5e-safe)
        h = acc.astype(w.dtype)              # MXU operands stay in param dtype

    # Output layer: Linear -> Softmax(dim=-1) over the *valid* columns only.
    w = params[-2][...]
    b = params[-1][...].astype(jnp.float32)
    logits = jnp.dot(h, w, preferred_element_type=jnp.float32) + b

    if out_padded > out_valid:
        col = lax.broadcasted_iota(jnp.int32, logits.shape, 1)
        logits = jnp.where(col < out_valid, logits, -1e30)

    m = jnp.max(logits, axis=-1, keepdims=True)
    e = jnp.exp(logits - m)
    denom = jnp.sum(e, axis=-1, keepdims=True)
    # EUP approx reciprocal (otherwise-idle slot) + one Newton-Raphson step to
    # recover full f32 accuracy for the tight tolerance check.
    r = pl.reciprocal(denom, approx=True)
    r = r * (2.0 - denom * r)
    out_ref[...] = (e * r).astype(out_ref.dtype)


def make_backprop_forward(weights, biases, *, compute_dtype=jnp.float32,
                          block_rows=1024, lane=128):
    """Pad/cast parameters ONCE and return a jitted forward(x) closure.

    weights[i]: (in_i, out_i) float32  (already transposed vs torch layout)
    biases[i]:  (1, out_i)    float32
    forward(x): (batch, in_dim) -> (batch, out_dim) softmax probabilities (f32)
    """
    num_layers = len(weights)
    in_dim = weights[0].shape[0]
    out_dim = weights[-1].shape[1]

    # Lane padding only on the N / output dims; the input contraction dim is
    # left unpadded (full last-dim block is legal even when < 128).
    dims = [in_dim] + [w.shape[1] for w in weights]
    pdims = [in_dim] + [_round_up(d, lane) for d in dims[1:]]

    padded = []
    for i, (w, b) in enumerate(zip(weights, biases)):
        wi, wo = w.shape
        wp = jnp.zeros((pdims[i], pdims[i + 1]), compute_dtype)
        wp = wp.at[:wi, :wo].set(w.astype(compute_dtype))
        bp = jnp.zeros((1, pdims[i + 1]), jnp.float32)
        bp = bp.at[:, :wo].set(b.astype(jnp.float32))
        padded.append(wp)
        padded.append(bp)

    itemsize = jnp.dtype(compute_dtype).itemsize
    param_bytes = sum(int(p.size) * p.dtype.itemsize for p in padded)
    # TODO(synk): if resident params approach ~half of VMEM (v7x: 64 MiB physical),
    # switch the weights from resident-VMEM to a pipelined per-layer BlockSpec.

    row_align = 16 if jnp.dtype(compute_dtype) == jnp.dtype(jnp.bfloat16) else 8

    kernel = functools.partial(
        _mlp_kernel,
        num_layers=num_layers,
        out_valid=out_dim,
        out_padded=pdims[-1],
    )

    def forward(x):
        batch = x.shape[0]
        assert x.shape[1] == in_dim, "input width must match layer_sizes[0]"

        # Row tiling: at least 2 grid steps when the batch allows it (so v7x's
        # two TensorCores split the batch via dimension_semantics="parallel"),
        # capped at block_rows so v5e/v6e amortize per-step overhead.
        rows = _round_up(batch, row_align)
        half = _round_up(max((rows + 1) // 2, row_align), row_align)
        bm = max(min(_round_up(block_rows, row_align), half), row_align)
        pb = _round_up(batch, bm)
        grid = (pb // bm,)

        xp = x.astype(compute_dtype)
        if pb > batch:
            xp = jnp.concatenate(
                [xp, jnp.zeros((pb - batch, in_dim), compute_dtype)], axis=0)

        # Explicit VMEM budget: resident params + double-buffered x/out tiles
        # + headroom for in-kernel f32 intermediates. Floor at the default
        # scoped limit, cap inside v7x's 64 MiB physical VMEM.
        io_bytes = 2 * bm * in_dim * itemsize + 2 * bm * pdims[-1] * 4
        hidden_bytes = 4 * bm * max(pdims) * 4
        needed = param_bytes + io_bytes + hidden_bytes
        vmem_limit = int(min(max(needed * 4, 32 << 20), 64 << 20))

        # x / out are pipelined over the batch grid; params are whole arrays
        # kept resident in VMEM (no per-step DMA / double-buffering).
        in_specs = [pl.BlockSpec((bm, in_dim), lambda i: (i, 0))]
        for _ in range(num_layers):
            in_specs.append(pl.BlockSpec(memory_space=pltpu.MemorySpace.VMEM))  # W
            in_specs.append(pl.BlockSpec(memory_space=pltpu.MemorySpace.VMEM))  # b
        out_specs = pl.BlockSpec((bm, pdims[-1]), lambda i: (i, 0))

        out = pl.pallas_call(
            kernel,
            out_shape=jax.ShapeDtypeStruct((pb, pdims[-1]), jnp.float32),
            grid=grid,
            in_specs=in_specs,
            out_specs=out_specs,
            compiler_params=pltpu.CompilerParams(
                dimension_semantics=("parallel",),   # batch axis -> both TCs on v7x
                vmem_limit_bytes=vmem_limit,
            ),
        )(xp, *padded)

        return out[:batch, :out_dim]

    return jax.jit(forward)


def init_params(layer_sizes, key):
    """Deterministic init mirroring torch.nn.Linear defaults:
    U(-1/sqrt(fan_in), 1/sqrt(fan_in)) for both weight and bias."""
    weights, biases = [], []
    for i in range(len(layer_sizes) - 1):
        fan_in, fan_out = layer_sizes[i], layer_sizes[i + 1]
        key, kw, kb = jax.random.split(key, 3)
        bound = 1.0 / math.sqrt(fan_in)
        # stored as (in, out): transpose of torch's (out, in)
        w = jax.random.uniform(kw, (fan_in, fan_out), jnp.float32, -bound, bound)
        b = jax.random.uniform(kb, (1, fan_out), jnp.float32, -bound, bound)
        weights.append(w)
        biases.append(b)
    return weights, biases


def reference_forward(x, weights, biases):
    h = x
    for w, b in zip(weights[:-1], biases[:-1]):
        h = jnp.maximum(h @ w + b, 0.0)
    logits = h @ weights[-1] + biases[-1]
    return jax.nn.softmax(logits, axis=-1)


if __name__ == "__main__":
    # layer_sizes = (input, hidden, hidden, output)
    layer_sizes = (16, 32, 32, 8)

    key = jax.random.PRNGKey(0)
    weights, biases = init_params(layer_sizes, key)

    # Parameters are padded/cast once here; forward() is a jitted closure.
    fwd_f32 = make_backprop_forward(weights, biases)

    # --- case 1: small batch, f32 (exact vs reference) ---
    batch = 8
    key, kx = jax.random.split(key)
    x = jax.random.normal(kx, (batch, layer_sizes[0]), jnp.float32)

    out = jax.block_until_ready(fwd_f32(x))
    ref = reference_forward(x, weights, biases)
    assert out.shape == (batch, layer_sizes[-1])
    assert jnp.allclose(out, ref, atol=1e-5, rtol=1e-5), "f32 mismatch vs reference"
    assert jnp.allclose(jnp.sum(out, axis=-1), 1.0, atol=1e-5), "softmax rows must sum to 1"

    # --- case 2: larger batch exercising the 2-step batch grid ---
    batch2 = 300
    key, kx2 = jax.random.split(key)
    x2 = jax.random.normal(kx2, (batch2, layer_sizes[0]), jnp.float32)
    out2 = jax.block_until_ready(fwd_f32(x2))
    ref2 = reference_forward(x2, weights, biases)
    assert out2.shape == (batch2, layer_sizes[-1])
    assert jnp.allclose(out2, ref2, atol=1e-5, rtol=1e-5), "tiled f32 mismatch vs reference"

    # --- case 3: bf16 MXU operands (v6e/v7x fast path), looser tolerance ---
    fwd_bf16 = make_backprop_forward(weights, biases, compute_dtype=jnp.bfloat16)
    out_bf16 = jax.block_until_ready(fwd_bf16(x2))
    assert out_bf16.shape == (batch2, layer_sizes[-1])
    assert jnp.allclose(out_bf16, ref2, atol=2e-2, rtol=2e-2), "bf16 mismatch vs reference"

    print("KERNEL_OK")
</pallas_src>

<mosaic_0001>
module attributes {stable_mosaic.version = 11 : i64} {
  func.func @_mlp_kernel(%arg0: i32, %arg1: memref<8x16xf32, #tpu.memory_space<vmem>>, %arg2: memref<16x128xf32, #tpu.memory_space<vmem>>, %arg3: memref<1x128xf32, #tpu.memory_space<vmem>>, %arg4: memref<128x128xf32, #tpu.memory_space<vmem>>, %arg5: memref<1x128xf32, #tpu.memory_space<vmem>>, %arg6: memref<128x128xf32, #tpu.memory_space<vmem>>, %arg7: memref<1x128xf32, #tpu.memory_space<vmem>>, %arg8: memref<8x128xf32, #tpu.memory_space<vmem>>) attributes {dimension_semantics = [#tpu.dimension_semantics<parallel>], iteration_bounds = array<i64: 1>, scalar_prefetch = 0 : i64, scratch_operands = 0 : i64, tpu.core_type = #tpu.core_type<tc>, window_params = [{transform_indices = @transform_0, window_bounds = array<i64: 8, 16>}, {pipeline_mode = #tpu.pipeline_mode<synchronous>, transform_indices = @transform_1, window_bounds = array<i64: 16, 128>}, {pipeline_mode = #tpu.pipeline_mode<synchronous>, transform_indices = @transform_2, window_bounds = array<i64: 1, 128>}, {pipeline_mode = #tpu.pipeline_mode<synchronous>, transform_indices = @transform_3, window_bounds = array<i64: 128, 128>}, {pipeline_mode = #tpu.pipeline_mode<synchronous>, transform_indices = @transform_4, window_bounds = array<i64: 1, 128>}, {pipeline_mode = #tpu.pipeline_mode<synchronous>, transform_indices = @transform_5, window_bounds = array<i64: 128, 128>}, {pipeline_mode = #tpu.pipeline_mode<synchronous>, transform_indices = @transform_6, window_bounds = array<i64: 1, 128>}, {transform_indices = @transform_7, window_bounds = array<i64: 8, 128>}]} {
    %c0 = arith.constant 0 : index
    %c0_0 = arith.constant 0 : index
    %0 = vector.load %arg1[%c0, %c0_0] : memref<8x16xf32, #tpu.memory_space<vmem>>, vector<8x16xf32>
    %c0_1 = arith.constant 0 : index
    %c0_2 = arith.constant 0 : index
    %1 = vector.load %arg2[%c0_1, %c0_2] : memref<16x128xf32, #tpu.memory_space<vmem>>, vector<16x128xf32>
    %c0_3 = arith.constant 0 : index
    %c0_4 = arith.constant 0 : index
    %2 = vector.load %arg3[%c0_3, %c0_4] : memref<1x128xf32, #tpu.memory_space<vmem>>, vector<1x128xf32>
    %cst = arith.constant dense<0.000000e+00> : vector<8x128xf32>
    %3 = tpu.matmul %0, %1, %cst {dimension_numbers = #tpu.dot_dimension_numbers<[1], [0], [0], [1], [0, 0, 1, 1], [], []>} : vector<8x16xf32>, vector<16x128xf32>, vector<8x128xf32> -> vector<8x128xf32>
    %4 = vector.broadcast %2 : vector<1x128xf32> to vector<8x128xf32>
    %5 = arith.addf %3, %4 : vector<8x128xf32>
    %cst_5 = arith.constant 0.000000e+00 : f32
    %6 = vector.broadcast %cst_5 : f32 to vector<8x128xf32>
    %7 = arith.maximumf %5, %6 : vector<8x128xf32>
    %c0_6 = arith.constant 0 : index
    %c0_7 = arith.constant 0 : index
    %8 = vector.load %arg4[%c0_6, %c0_7] : memref<128x128xf32, #tpu.memory_space<vmem>>, vector<128x128xf32>
    %c0_8 = arith.constant 0 : index
    %c0_9 = arith.constant 0 : index
    %9 = vector.load %arg5[%c0_8, %c0_9] : memref<1x128xf32, #tpu.memory_space<vmem>>, vector<1x128xf32>
    %cst_10 = arith.constant dense<0.000000e+00> : vector<8x128xf32>
    %10 = tpu.matmul %7, %8, %cst_10 {dimension_numbers = #tpu.dot_dimension_numbers<[1], [0], [0], [1], [0, 0, 1, 1], [], []>} : vector<8x128xf32>, vector<128x128xf32>, vector<8x128xf32> -> vector<8x128xf32>
    %11 = vector.broadcast %9 : vector<1x128xf32> to vector<8x128xf32>
    %12 = arith.addf %10, %11 : vector<8x128xf32>
    %cst_11 = arith.constant 0.000000e+00 : f32
    %13 = vector.broadcast %cst_11 : f32 to vector<8x128xf32>
    %14 = arith.maximumf %12, %13 : vector<8x128xf32>
    %c0_12 = arith.constant 0 : index
    %c0_13 = arith.constant 0 : index
    %15 = vector.load %arg6[%c0_12, %c0_13] : memref<128x128xf32, #tpu.memory_space<vmem>>, vector<128x128xf32>
    %c0_14 = arith.constant 0 : index
    %c0_15 = arith.constant 0 : index
    %16 = vector.load %arg7[%c0_14, %c0_15] : memref<1x128xf32, #tpu.memory_space<vmem>>, vector<1x128xf32>
    %cst_16 = arith.constant dense<0.000000e+00> : vector<8x128xf32>
    %17 = tpu.matmul %14, %15, %cst_16 {dimension_numbers = #tpu.dot_dimension_numbers<[1], [0], [0], [1], [0, 0, 1, 1], [], []>} : vector<8x128xf32>, vector<128x128xf32>, vector<8x128xf32> -> vector<8x128xf32>
    %18 = vector.broadcast %16 : vector<1x128xf32> to vector<8x128xf32>
    %19 = arith.addf %17, %18 : vector<8x128xf32>
    %20 = tpu.iota {dimensions = array<i32: 1>} : vector<8x128xi32>
    %c8_i32 = arith.constant 8 : i32
    %21 = vector.broadcast %c8_i32 : i32 to vector<8x128xi32>
    %22 = arith.cmpi slt, %20, %21 : vector<8x128xi32>
    %cst_17 = arith.constant -1.000000e+30 : f32
    %23 = vector.broadcast %cst_17 : f32 to vector<8x128xf32>
    %24 = arith.select %22, %19, %23 : vector<8x128xi1>, vector<8x128xf32>
    %cst_18 = arith.constant dense<0xFF800000> : vector<8xf32>
    %25 = vector.multi_reduction <maximumf>, %24, %cst_18 [1] : vector<8x128xf32> to vector<8xf32>
    %26 = vector.shape_cast %25 : vector<8xf32> to vector<8x1xf32>
    %27 = vector.broadcast %26 : vector<8x1xf32> to vector<8x128xf32>
    %28 = arith.subf %24, %27 : vector<8x128xf32>
    %29 = math.exp %28 : vector<8x128xf32>
    %cst_19 = arith.constant dense<0.000000e+00> : vector<8xf32>
    %30 = vector.multi_reduction <add>, %29, %cst_19 [1] : vector<8x128xf32> to vector<8xf32>
    %31 = vector.shape_cast %30 : vector<8xf32> to vector<8x1xf32>
    %32 = tpu.reciprocal %31 {approx = true} : vector<8x1xf32> -> vector<8x1xf32>
    %33 = arith.mulf %31, %32 : vector<8x1xf32>
    %cst_20 = arith.constant 2.000000e+00 : f32
    %34 = vector.broadcast %cst_20 : f32 to vector<8x1xf32>
    %35 = arith.subf %34, %33 : vector<8x1xf32>
    %36 = arith.mulf %32, %35 : vector<8x1xf32>
    %37 = vector.broadcast %36 : vector<8x1xf32> to vector<8x128xf32>
    %38 = arith.mulf %29, %37 : vector<8x128xf32>
    %c0_21 = arith.constant 0 : index
    %c0_22 = arith.constant 0 : index
    %39 = vector.load %arg8[%c0_21, %c0_22] : memref<8x128xf32, #tpu.memory_space<vmem>>, vector<8x128xf32>
    tpu.vector_store %arg8[%c0_21, %c0_22], %38 {strides = array<i32>} : memref<8x128xf32, #tpu.memory_space<vmem>>, vector<8x128xf32>,
    return
  }
  func.func @transform_0(%arg0: i32) -> (i32, i32) {
    %c0_i32 = arith.constant 0 : i32
    %c0_i32_0 = arith.constant 0 : i32
    return %arg0, %c0_i32 : i32, i32
  }
  func.func @transform_1(%arg0: i32) -> (i32, i32) {
    %c0_i32 = arith.constant 0 : i32
    %c0_i32_0 = arith.constant 0 : i32
    %c0_i32_1 = arith.constant 0 : i32
    return %c0_i32, %c0_i32_0 : i32, i32
  }
  func.func @transform_2(%arg0: i32) -> (i32, i32) {
    %c0_i32 = arith.constant 0 : i32
    %c0_i32_0 = arith.constant 0 : i32
    %c0_i32_1 = arith.constant 0 : i32
    return %c0_i32, %c0_i32_0 : i32, i32
  }
  func.func @transform_3(%arg0: i32) -> (i32, i32) {
    %c0_i32 = arith.constant 0 : i32
    %c0_i32_0 = arith.constant 0 : i32
    %c0_i32_1 = arith.constant 0 : i32
    return %c0_i32, %c0_i32_0 : i32, i32
  }
  func.func @transform_4(%arg0: i32) -> (i32, i32) {
    %c0_i32 = arith.constant 0 : i32
    %c0_i32_0 = arith.constant 0 : i32
    %c0_i32_1 = arith.constant 0 : i32
    return %c0_i32, %c0_i32_0 : i32, i32
  }
  func.func @transform_5(%arg0: i32) -> (i32, i32) {
    %c0_i32 = arith.constant 0 : i32
    %c0_i32_0 = arith.constant 0 : i32
    %c0_i32_1 = arith.constant 0 : i32
    return %c0_i32, %c0_i32_0 : i32, i32
  }
  func.func @transform_6(%arg0: i32) -> (i32, i32) {
    %c0_i32 = arith.constant 0 : i32
    %c0_i32_0 = arith.constant 0 : i32
    %c0_i32_1 = arith.constant 0 : i32
    return %c0_i32, %c0_i32_0 : i32, i32
  }
  func.func @transform_7(%arg0: i32) -> (i32, i32) {
    %c0_i32 = arith.constant 0 : i32
    %c0_i32_0 = arith.constant 0 : i32
    return %arg0, %c0_i32 : i32, i32
  }
}

</mosaic_0001>

<bundles_post_ra>
// kernel: forward.1
= control target key start
LH: loop header
LB: loop body
LE: loop exit
PB: predicated region body
PF: predicated region fallthrough
CT: control target
= control target key end

     0   :  { %12 = vsyncpa [#allocation3], 0  ;;  %s835_s0 = inlined_call_operand.hbm [shape: f32[8,16], index: 0, kind: input, shape index: {}]   ;;  %s836_s1 = inlined_call_operand.hbm [shape: f32[16,128], index: 1, kind: input, shape index: {}]   ;;  %s837_s2 = inlined_call_operand.vmem [shape: f32[1,128], index: 2, kind: input, shape index: {}]   ;;  %s838_s3 = inlined_call_operand.hbm [shape: f32[128,128], index: 3, kind: input, shape index: {}]   ;;  %s839_s4 = inlined_call_operand.vmem [shape: f32[1,128], index: 4, kind: input, shape index: {}]   ;;  %s840_s5 = inlined_call_operand.hbm [shape: f32[128,128], index: 5, kind: input, shape index: {}]   ;;  %s841_s6 = inlined_call_operand.vmem [shape: f32[1,128], index: 6, kind: input, shape index: {}]   ;;  %s842_s7 = inlined_call_operand.hbm [shape: f32[8,128], index: 7, kind: output, shape index: {}]  }
   0x1   :  { %13 = vsyncpa [#allocation6], 0 }
   0x2   :  { %14 = vsyncpa [#allocation9], 0 }
   0x3   :  { %15 = vsyncpa [#allocation4], 0  ;;  %s687_s24 = smov [#allocation5]   ;;  %s569_s28 = scalar_lea.hbm %s836_s1, 256 }
   0x4   :  { %s31_s25 = sshll.u32 %s687_s24, 4  ;;  %p570_p0 = scmp.ne.s32.totalorder %s836_s1, %s569_s28  ;;  %s32_s25 = int_to_ptr.vmem [resolvable:$true] %s31_s25 }
   0x5   :  { %p573_p1 = scmp.lt.u32.totalorder %s569_s28, %s836_s1 }
   0x7   :  { %p575_p2 = pnand %p573_p1, %p570_p0 }
   0x9   :  { %578 = shalt.err (!%p575_p2)
}
   0xa   :  { %s579_s10 = scalar_lea.vmem %s32_s25, 256  ;;  %p584_p4 = scmp.lt.s32.totalorder %s32_s25, %s32_s25 }
   0xb   :  { %p580_p3 = scmp.ne.s32.totalorder %s32_s25, %s579_s10  ;;  %p585_p5 = scmp.lt.s32.totalorder %s579_s10, %s579_s10 }
   0xd   :  { %p586_p6 = por %p585_p5, %p584_p4 }
   0xf   :  { %p587_p7 = pnand %p586_p6, %p580_p3 }
  0x11   :  { %590 = shalt.err (!%p587_p7)
}
  0x12   :  { %s688_s11 = smov 128   ;;  %s689_s12 = smov 8  }
  0x13   :  { %37 = dma.hbm_to_vmem [thread:$0]  %s836_s1, 256, %s32_s25, [#allocation6], %s688_s11, %s688_s11, %s689_s12  }
  0x14   :  { %s690_s15 = smov [#allocation2]   ;;  %s691_s17 = smov [#allocation7]  }
  0x15   :  { %s22_s16 = sshll.u32 %s690_s15, 4  ;;  %s45_s18 = sshll.u32 %s691_s17, 4  ;;  %s23_s16 = int_to_ptr.vmem [resolvable:$true] %s22_s16  ;;  %s46_s18 = int_to_ptr.vmem [resolvable:$true] %s45_s18 }
  0x16   :  { %s591_s21 = scalar_lea.hbm %s835_s0, 128 }
  0x17   :  { %p592_p8 = scmp.ne.s32.totalorder %s835_s0, %s591_s21  ;;  %p595_p9 = scmp.lt.u32.totalorder %s591_s21, %s835_s0 }
  0x19   :  { %p597_p10 = pnand %p595_p9, %p592_p8 }
  0x1b   :  { %600 = shalt.err (!%p597_p10)
}
  0x1c   :  { %s601_s1 = scalar_lea.vmem %s23_s16, 128  ;;  %p606_p12 = scmp.lt.s32.totalorder %s23_s16, %s23_s16 }
  0x1d   :  { %p602_p11 = scmp.ne.s32.totalorder %s23_s16, %s601_s1  ;;  %p607_p13 = scmp.lt.s32.totalorder %s601_s1, %s601_s1 }
  0x1f   :  { %p608_p0 = por %p607_p13, %p606_p12 }
  0x21   :  { %p609_p1 = pnand %p608_p0, %p602_p11 }
  0x23   :  { %612 = shalt.err (!%p609_p1)
}
  0x24   :  { %25 = dma.hbm_to_vmem [thread:$0]  %s835_s0, 128, %s23_s16, [#allocation3]  }
  0x25   :  { %s613_s30 = scalar_lea.hbm %s838_s3, 2048 }
  0x26   :  { %p614_p2 = scmp.ne.s32.totalorder %s838_s3, %s613_s30  ;;  %p617_p3 = scmp.lt.u32.totalorder %s613_s30, %s838_s3 }
  0x28   :  { %p619_p4 = pnand %p617_p3, %p614_p2 }
  0x2a   :  { %622 = shalt.err (!%p619_p4)
}
  0x2b   :  { %s623_s14 = scalar_lea.vmem %s46_s18, 2048  ;;  %p628_p6 = scmp.lt.s32.totalorder %s46_s18, %s46_s18 }
  0x2c   :  { %p624_p5 = scmp.ne.s32.totalorder %s46_s18, %s623_s14  ;;  %p629_p7 = scmp.lt.s32.totalorder %s623_s14, %s623_s14 }
  0x2e   :  { %p630_p8 = por %p629_p7, %p628_p6 }
  0x30   :  { %p631_p9 = pnand %p630_p8, %p624_p5 }
  0x32   :  { %634 = shalt.err (!%p631_p9)
}
  0x33   :  { %51 = dma.hbm_to_vmem [thread:$0]  %s838_s3, 2048, %s46_s18, [#allocation6], %s688_s11, %s688_s11, %s689_s12  }
  0x34   :  { %s692_s16 = smov [#allocation8]   ;;  %s635_s21 = scalar_lea.hbm %s840_s5, 2048 }
  0x35   :  { %s59_s17 = sshll.u32 %s692_s16, 4  ;;  %p636_p10 = scmp.ne.s32.totalorder %s840_s5, %s635_s21  ;;  %s60_s17 = int_to_ptr.vmem [resolvable:$true] %s59_s17 }
  0x36   :  { %p639_p11 = scmp.lt.u32.totalorder %s635_s21, %s840_s5 }
  0x38   :  { %p641_p12 = pnand %p639_p11, %p636_p10 }
  0x3a   :  { %644 = shalt.err (!%p641_p12)
}
  0x3b   :  { %s645_s1 = scalar_lea.vmem %s60_s17, 2048  ;;  %p650_p0 = scmp.lt.s32.totalorder %s60_s17, %s60_s17 }
  0x3c   :  { %p646_p13 = scmp.ne.s32.totalorder %s60_s17, %s645_s1  ;;  %p651_p1 = scmp.lt.s32.totalorder %s645_s1, %s645_s1 }
  0x3e   :  { %p652_p2 = por %p651_p1, %p650_p0 }
  0x40   :  { %p653_p3 = pnand %p652_p2, %p646_p13 }
  0x42   :  { %656 = shalt.err (!%p653_p3)
}
  0x43   :  { %65 = dma.hbm_to_vmem [thread:$0]  %s840_s5, 2048, %s60_s17, [#allocation9], %s688_s11, %s688_s11, %s689_s12  }
  0x44   :  { %679 = dma.done.wait [#allocation3], 128  }
  0x45   :  { %680 = vsyncadd [#allocation3], 4294967168 }
  0x46   :  { %681 = dma.done.wait [#allocation6], 2304  }
  0x47   :  { %682 = vsyncadd [#allocation6], 4294964992 }
  0x48   :  { %683 = dma.done.wait [#allocation9], 2048  }
  0x49   :  { %684 = vsyncadd [#allocation9], 4294965248  ;;  %v693_v0 = vmov 0.0|0.0   ;;  %vm694_vm0 = vmmov 0   ;;  %v695_v1 = vmov 0.0   ;;  %v81_v2 = vld [vmem:[#allocation5] sm:$0xff] }
  0x4a   :  { %504 = vmatprep.subr.bf16.mxu0 %v693_v0  ;;  %431 = vmatprep.mubr.msk.f32.mxu0 %vm694_vm0, %v695_v1  ;;  %v82_v3 = vld [vmem:[#allocation5 + $0x8] sm:$0xff]  ;;  %v165_v5 = vld [vmem:[#allocation7] sm:$0xff]  ;;  %v166_v6 = vld [vmem:[#allocation7 + $0x8] sm:$0xff]  ;;  %vm90_vm1 = vcmask 130048  }
  0x4b   :  { %507 = vmatprep.subr.bf16.mxu1 %v693_v0  ;;  %466 = vmatprep.mubr.msk.f32.mxu1 %vm694_vm0, %v695_v1  ;;  %v505_v4 = vpack.c.bf16 %v82_v3, %v81_v2  ;;  %v167_v7 = vld [vmem:[#allocation7 + $0x10] sm:$0xff]  ;;  %v508_v8 = vpack.c.bf16 %v166_v6, %v165_v5  ;;  %v168_v9 = vld [vmem:[#allocation7 + $0x18] sm:$0xff]  ;;  %v80_v10 = vld [vmem:[#allocation2] sm:$0xff] }
  0x4c   :  { %v511_v11 = vpack.c.bf16 %v168_v9, %v167_v7  ;;  %v169_v12 = vld [vmem:[#allocation7 + $0x20] sm:$0xff]  ;;  %v170_v13 = vld [vmem:[#allocation7 + $0x28] sm:$0xff]  ;;  %v171_v15 = vld [vmem:[#allocation7 + $0x30] sm:$0xff] }
  0x4d   :  { %506 = vmatpush3.bf16.msra.mxu0 %v505_v4  ;;  %509 = vmatpush3.bf16.msra.mxu1 %v508_v8  ;;  %v514_v14 = vpack.c.bf16 %v170_v13, %v169_v12  ;;  %v172_v16 = vld [vmem:[#allocation7 + $0x38] sm:$0xff]  ;;  %v173_v18 = vld [vmem:[#allocation7 + $0x40] sm:$0xff]  ;;  %v174_v19 = vld [vmem:[#allocation7 + $0x48] sm:$0xff] }
  0x4e   :  { %531 = vmatprep.subr.bf16.mxu0 %v693_v0  ;;  %510 = vmatprep.subr.bf16.mxu1 %v693_v0  ;;  %v517_v17 = vpack.c.bf16 %v172_v16, %v171_v15  ;;  %v520_v20 = vpack.c.bf16 %v174_v19, %v173_v18  ;;  %v175_v21 = vld [vmem:[#allocation7 + $0x50] sm:$0xff]  ;;  %v176_v22 = vld [vmem:[#allocation7 + $0x58] sm:$0xff]  ;;  %v177_v24 = vld [vmem:[#allocation7 + $0x60] sm:$0xff] }
  0x4f   :  { %v523_v23 = vpack.c.bf16 %v176_v22, %v175_v21  ;;  %v178_v25 = vld [vmem:[#allocation7 + $0x68] sm:$0xff]  ;;  %v179_v27 = vld [vmem:[#allocation7 + $0x70] sm:$0xff]  ;;  %v180_v28 = vld [vmem:[#allocation7 + $0x78] sm:$0xff] }
  0x50   :  { %432 = vmatmul.mubr.msk.f32.vlgmr.msra.gmra.mrb[0].mxu0 %vm90_vm1, %v80_v10  ;;  %v526_v26 = vpack.c.bf16 %v178_v25, %v177_v24  ;;  %v529_v29 = vpack.c.bf16 %v180_v28, %v179_v27  ;;  %v259_v30 = vld [vmem:[#allocation8] sm:$0xff]  ;;  %v260_v31 = vld [vmem:[#allocation8 + $0x8] sm:$0xff]  ;;  %v261_v32 = vld [vmem:[#allocation8 + $0x10] sm:$0xff] }
  0x51   :  { %501 = vmatprep.mubr.msk.f32.mxu0 %vm694_vm0, %v695_v1  ;;  %512 = vmatpush3.bf16.msra.mxu1 %v511_v11  ;;  %v532_v33 = vpack.c.bf16 %v260_v31, %v259_v30  ;;  %v262_v34 = vld [vmem:[#allocation8 + $0x18] sm:$0xff]  ;;  %v263_v36 = vld [vmem:[#allocation8 + $0x20] sm:$0xff]  ;;  %v264_v37 = vld [vmem:[#allocation8 + $0x28] sm:$0xff] }
  0x52   :  { %513 = vmatprep.subr.bf16.mxu1 %v693_v0  ;;  %v535_v35 = vpack.c.bf16 %v262_v34, %v261_v32  ;;  %v538_v38 = vpack.c.bf16 %v264_v37, %v263_v36  ;;  %v265_v39 = vld [vmem:[#allocation8 + $0x30] sm:$0xff]  ;;  %v266_v40 = vld [vmem:[#allocation8 + $0x38] sm:$0xff]  ;;  %v267_v42 = vld [vmem:[#allocation8 + $0x40] sm:$0xff] }
  0x53   :  { %533 = vmatpush3.bf16.msra.mxu0 %v532_v33  ;;  %v541_v41 = vpack.c.bf16 %v266_v40, %v265_v39  ;;  %v268_v43 = vld [vmem:[#allocation8 + $0x48] sm:$0xff]  ;;  %v269_v45 = vld [vmem:[#allocation8 + $0x50] sm:$0xff]  ;;  %v270_v46 = vld [vmem:[#allocation8 + $0x58] sm:$0xff] }
  0x54   :  { %534 = vmatprep.subr.bf16.mxu0 %v693_v0  ;;  %v544_v44 = vpack.c.bf16 %v268_v43, %v267_v42  ;;  %v547_v47 = vpack.c.bf16 %v270_v46, %v269_v45  ;;  %v271_v48 = vld [vmem:[#allocation8 + $0x60] sm:$0xff]  ;;  %v272_v49 = vld [vmem:[#allocation8 + $0x68] sm:$0xff]  ;;  %v273_v56 = vld [vmem:[#allocation8 + $0x70] sm:$0xff] }
  0x55   :  { %515 = vmatpush3.bf16.msra.mxu1 %v514_v14  ;;  %v550_v50 = vpack.c.bf16 %v272_v49, %v271_v48  ;;  %v386_v51 = vld [vmem:[%s837_s2] ss:$0 sm:$0xff]  ;;  %v274_v57 = vld [vmem:[#allocation8 + $0x78] sm:$0xff] }
  0x56   :  { %516 = vmatprep.subr.bf16.mxu1 %v693_v0  ;;  %v553_v58 = vpack.c.bf16 %v274_v57, %v273_v56  ;;  %v388_v59 = vld [vmem:[%s839_s4] ss:$0 sm:$0xff]  ;;  %s696_s4 = smov [#allocation10]  }
  0x57   :  { %536 = vmatpush3.bf16.msra.mxu0 %v535_v35  ;;  %v389_v2 = vld [vmem:[%s841_s6] ss:$0 sm:$0xff]  ;;  %s375_s28 = sshll.u32 %s696_s4, 4  ;;  %s376_s28 = int_to_ptr.vmem [resolvable:$true] %s375_s28 }
  0x58   :  { %537 = vmatprep.subr.bf16.mxu0 %v693_v0  ;;  %s657_s6 = scalar_lea.vmem %s376_s28, 128  ;;  %p662_p5 = scmp.lt.s32.totalorder %s376_s28, %s376_s28 }
  0x59   :  { %518 = vmatpush3.bf16.msra.mxu1 %v517_v17  ;;  %p658_p4 = scmp.ne.s32.totalorder %s376_s28, %s657_s6  ;;  %p663_p6 = scmp.lt.s32.totalorder %s657_s6, %s657_s6 }
  0x5a   :  { %519 = vmatprep.subr.bf16.mxu1 %v693_v0 }
  0x5b   :  { %539 = vmatpush3.bf16.msra.mxu0 %v538_v38  ;;  %p664_p7 = por %p663_p6, %p662_p5 }
  0x5c   :  { %540 = vmatprep.subr.bf16.mxu0 %v693_v0 }
  0x5d   :  { %521 = vmatpush3.bf16.msra.mxu1 %v520_v20  ;;  %p665_p8 = pnand %p664_p7, %p658_p4 }
  0x5e   :  { %522 = vmatprep.subr.bf16.mxu1 %v693_v0 }
  0x5f   :  { %542 = vmatpush3.bf16.msra.mxu0 %v541_v41 }
  0x60   :  { %543 = vmatprep.subr.bf16.mxu0 %v693_v0 }
  0x61   :  { %524 = vmatpush3.bf16.msra.mxu1 %v523_v23 }
  0x62   :  { %525 = vmatprep.subr.bf16.mxu1 %v693_v0 }
  0x63   :  { %545 = vmatpush3.bf16.msra.mxu0 %v544_v44 }
  0x64   :  { %546 = vmatprep.subr.bf16.mxu0 %v693_v0 }
  0x65   :  { %527 = vmatpush3.bf16.msra.mxu1 %v526_v26 }
  0x66   :  { %528 = vmatprep.subr.bf16.mxu1 %v693_v0 }
  0x67   :  { %548 = vmatpush3.bf16.msra.mxu0 %v547_v47 }
  0x68   :  { %549 = vmatprep.subr.bf16.mxu0 %v693_v0 }
  0x69   :  { %530 = vmatpush3.bf16.msra.mxu1 %v529_v29 }
  0x6b   :  { %551 = vmatpush3.bf16.msra.mxu0 %v550_v50 }
  0x6c   :  { %552 = vmatprep.subr.bf16.mxu0 %v693_v0  ;;  %v352_v0 = vlaneseq }
  0x6e   :  { %v353_v1 = vand.u32 127, %v352_v0 }
  0x6f   :  { %554 = vmatpush3.bf16.msra.mxu0 %v553_v58 }
  0x70   :  { %vm354_vm2 = vcmp.lt.s32.totalorder %v353_v1, 8 }
 0x123   :  { %v160_v52 = vpop.f32.mrb[0].mxu0 }
 0x124   :  { %v161_v53 = vadd.f32 %v386_v51, %v160_v52  ;;  %v433_v54 = vpop.f32.mrb[1].mxu0 }
 0x126   :  { %v164_v55 = vmax.f32 %v161_v53, 0.0 }
 0x128   :  { %467 = vmatmul.mubr.f32.vlgmr.msra.gmra.mrb[0].mxu1 %v164_v55 }
 0x1fb   :  { %v254_v60 = vpop.f32.mrb[0].mxu1 }
 0x1fc   :  { %v255_v61 = vadd.f32 %v388_v59, %v254_v60  ;;  %v468_v62 = vpop.f32.mrb[1].mxu1 }
 0x1fe   :  { %v258_v63 = vmax.f32 %v255_v61, 0.0 }
 0x200   :  { %502 = vmatmul.mubr.f32.vlgmr.msra.gmra.mrb[2].mxu0 %v258_v63 }
 0x2d3   :  { %v348_v3 = vpop.f32.mrb[2].mxu0 }
 0x2d4   :  { %v349_v4 = vadd.f32 %v389_v2, %v348_v3  ;;  %v503_v5 = vpop.f32.mrb[3].mxu0 }
 0x2d6   :  { %v355_v6 = vsel %vm354_vm2, %v349_v4, -1e+30 }
 0x2d7   :  { %356 = vmax.xlane.f32.xlu0 %v355_v6 }
 0x364   :  { %v357_v7 = vpop.xlane.xlu0 %356 }
 0x365   :  { %v358_v8 = vsub.f32 %v355_v6, %v357_v7 }
 0x367   :  { %v359_v9 = vmul.f32 1.442695, %v358_v8 }
 0x369   :  { %565 = vpow2.f32 %v359_v9 }
 0x373   :  { %v566_v10 = vpop.eup %565 }
 0x374   :  { %361 = vadd.xlane.f32.xlu0 %v566_v10 }
 0x401   :  { %v362_v11 = vpop.xlane.xlu0 %361 }
 0x402   :  { %567 = vrcp.f32 %v362_v11 }
 0x40c   :  { %v568_v12 = vpop.eup %567 }
 0x40d   :  { %v364_v13 = vmul.f32 %v568_v12, %v362_v11 }
 0x40f   :  { %v365_v14 = vsub.f32 2.0, %v364_v13 }
 0x411   :  { %v366_v15 = vmul.f32 %v568_v12, %v365_v14 }
 0x413   :  { %v367_v16 = vmul.f32 %v566_v10, %v366_v15 }
 0x415   :  { %368 = vst [vmem:[#allocation10] sm:$0xff] %v367_v16 }
 0x416   :  { %668 = shalt.err (!%p665_p8)
}
 0x417   :  { %s669_s8 = scalar_lea.hbm %s842_s7, 128 }
 0x418   :  { %p670_p9 = scmp.ne.s32.totalorder %s842_s7, %s669_s8  ;;  %p673_p10 = scmp.lt.u32.totalorder %s669_s8, %s842_s7 }
 0x41a   :  { %p675_p11 = pnand %p673_p10, %p670_p9 }
 0x41c   :  { %678 = shalt.err (!%p675_p11)
}
 0x41d   :  { %378 = dma.vmem_to_hbm [thread:$0]  %s376_s28, 128, %s842_s7, [#allocation4]  }
 0x41e   :  { %685 = dma.done.wait [#allocation4], 128  }
 0x41f   :  { %686 = vsyncadd [#allocation4], 4294967168 }
 0x420   :  { %382 = vsyncpa [#allocation3], 1 }
 0x421   :  { %383 = vsyncpa [#allocation6], 1 }
 0x422   :  { %384 = vsyncpa [#allocation9], 1 }
 0x423   :  { %385 = vsyncpa [#allocation4], 1 }

</bundles_post_ra>
